<compile_context>
chip_gen: v5e
topology: v5e:2x2
jax: 0.10.0
libtpu: 0.0.40
codegen_flags: <defaults>
</compile_context>

<pallas_src>
import jax
import jax.numpy as jnp
from jax.experimental import pallas as pl
from jax.experimental.pallas import tpu as pltpu


def _round_up(x: int, m: int) -> int:
    return ((x + m - 1) // m) * m


def _spose_kernel(x_ref, w_ref, slope_ref, icpt_ref, o_ref, acc_ref):
    """One (tm, tn) output tile; the k grid axis accumulates the contraction."""
    k = pl.program_id(2)

    @pl.when(k == 0)
    def _():
        acc_ref[...] = jnp.zeros_like(acc_ref)

    # w_ref holds a (tn, tk) block of fc_weight in its native (out, in) layout;
    # the transposed-RHS contraction is handled natively by the MXU path
    # (same pattern as q @ k.T in flash attention), so no wrapper transpose.
    acc_ref[...] += jnp.dot(
        x_ref[...], w_ref[...].T, preferred_element_type=jnp.float32
    )

    @pl.when(k == pl.num_programs(2) - 1)
    def _():
        # Fused epilogue: per-row intercept + per-row slope * logits.
        o_ref[...] = (
            icpt_ref[...] + slope_ref[...] * acc_ref[...]
        ).astype(o_ref.dtype)


def spose_id_ic_forward(x, ids, fc_weight, slopes, intercepts,
                        *, tm=256, tn=256, tk=512):
    """SPoSE_ID_IC forward.

    x:          (B, in_size)                  f32
    ids:        (B,)                          int32 participant ids
    fc_weight:  (out_size, in_size)           f32  (nn.Linear weight, bias=False)
    slopes:     (num_participants, out_size)  f32
    intercepts: (num_participants, out_size)  f32
    returns:    (B, out_size)                 f32
    """
    B, in_size = x.shape
    out_size = fc_weight.shape[0]

    # Embedding lookups (row gather by participant id) — done as an XLA gather.
    w_i = jnp.take(slopes, ids, axis=0).astype(jnp.float32)       # (B, out)
    ic_i = jnp.take(intercepts, ids, axis=0).astype(jnp.float32)  # (B, out)

    # Tile sizes: cap at the (padded) problem size, lane dims multiples of 128,
    # sublane dims multiples of 8.  No divisibility asserts: padding handles
    # arbitrary shapes.
    tm = min(tm, _round_up(B, 8))
    tn = min(tn, _round_up(out_size, 128))
    tk = min(tk, _round_up(in_size, 128))

    Bp = _round_up(B, tm)
    Np = _round_up(out_size, tn)
    Kp = _round_up(in_size, tk)

    x_p = jnp.pad(x, ((0, Bp - B), (0, Kp - in_size)))
    w_p = jnp.pad(fc_weight, ((0, Np - out_size), (0, Kp - in_size)))
    w_i_p = jnp.pad(w_i, ((0, Bp - B), (0, Np - out_size)))
    ic_i_p = jnp.pad(ic_i, ((0, Bp - B), (0, Np - out_size)))

    grid = (Bp // tm, Np // tn, Kp // tk)

    # Advisory cost hint for XLA's scheduler.
    cost = pl.CostEstimate(
        flops=2 * Bp * Np * Kp,
        transcendentals=0,
        bytes_accessed=4 * (Bp * Kp + grid[0] * Np * Kp + 3 * Bp * Np),
    )

    out = pl.pallas_call(
        _spose_kernel,
        out_shape=jax.ShapeDtypeStruct((Bp, Np), x.dtype),
        grid_spec=pltpu.PrefetchScalarGridSpec(
            num_scalar_prefetch=0,
            grid=grid,
            in_specs=[
                pl.BlockSpec((tm, tk), lambda i, j, k: (i, k)),  # x tile
                pl.BlockSpec((tn, tk), lambda i, j, k: (j, k)),  # fc_weight tile
                pl.BlockSpec((tm, tn), lambda i, j, k: (i, j)),  # slopes[id] tile
                pl.BlockSpec((tm, tn), lambda i, j, k: (i, j)),  # intercepts[id] tile
            ],
            out_specs=pl.BlockSpec((tm, tn), lambda i, j, k: (i, j)),
            scratch_shapes=[pltpu.VMEM((tm, tn), jnp.float32)],
        ),
        compiler_params=pltpu.CompilerParams(
            dimension_semantics=("parallel", "parallel", "arbitrary"),
            vmem_limit_bytes=32 * 1024 * 1024,  # fits v5e/v6e/v7x scoped VMEM
        ),
        cost_estimate=cost,
    )(x_p, w_p, w_i_p, ic_i_p)

    # Strip the padding added for tiling.
    return out[:B, :out_size]


if __name__ == "__main__":
    key = jax.random.PRNGKey(0)
    k1, k2, k3, k4, k5 = jax.random.split(key, 5)

    # Small shapes consistent with the module.
    batch, in_size, out_size, num_participants = 16, 32, 50, 8

    x = jax.random.normal(k1, (batch, in_size), dtype=jnp.float32)
    ids = jax.random.randint(k2, (batch,), 0, num_participants, dtype=jnp.int32)

    # Parameter init matching SPoSE_ID_IC._initialize_weights:
    #   Linear weight ~ N(0.1, 0.01); Embedding weights ~ N(0.5, 0.15)
    fc_weight = 0.1 + 0.01 * jax.random.normal(
        k3, (out_size, in_size), dtype=jnp.float32)
    slopes = 0.5 + 0.15 * jax.random.normal(
        k4, (num_participants, out_size), dtype=jnp.float32)
    intercepts = 0.5 + 0.15 * jax.random.normal(
        k5, (num_participants, out_size), dtype=jnp.float32)

    out = spose_id_ic_forward(x, ids, fc_weight, slopes, intercepts)
    out = jax.block_until_ready(out)

    # Pure-JAX reference with identical semantics to the PyTorch forward.
    ref = intercepts[ids] + slopes[ids] * (x @ fc_weight.T)
    assert out.shape == ref.shape and out.dtype == ref.dtype
    assert jnp.allclose(out, ref, atol=1e-2, rtol=1e-2), float(
        jnp.max(jnp.abs(out - ref)))

    print("KERNEL_OK")
</pallas_src>

<mosaic_0001>
module attributes {stable_mosaic.version = 11 : i64} {
  func.func @_spose_kernel(%arg0: i32, %arg1: i32, %arg2: i32, %arg3: memref<16x128xf32, #tpu.memory_space<vmem>>, %arg4: memref<128x128xf32, #tpu.memory_space<vmem>>, %arg5: memref<16x128xf32, #tpu.memory_space<vmem>>, %arg6: memref<16x128xf32, #tpu.memory_space<vmem>>, %arg7: memref<16x128xf32, #tpu.memory_space<vmem>>, %arg8: memref<16x128xf32, #tpu.memory_space<vmem>>) attributes {dimension_semantics = [#tpu.dimension_semantics<parallel>, #tpu.dimension_semantics<parallel>, #tpu.dimension_semantics<arbitrary>], iteration_bounds = array<i64: 1, 1, 1>, scalar_prefetch = 0 : i64, scratch_operands = 1 : i64, tpu.core_type = #tpu.core_type<tc>, window_params = [{transform_indices = @transform_0, window_bounds = array<i64: 16, 128>}, {transform_indices = @transform_1, window_bounds = array<i64: 128, 128>}, {transform_indices = @transform_2, window_bounds = array<i64: 16, 128>}, {transform_indices = @transform_3, window_bounds = array<i64: 16, 128>}, {transform_indices = @transform_4, window_bounds = array<i64: 16, 128>}]} {
    %c0_i32 = arith.constant 0 : i32
    %0 = arith.cmpi eq, %arg2, %c0_i32 : i32
    %1 = arith.extui %0 : i1 to i32
    %c0_i32_0 = arith.constant 0 : i32
    %2 = arith.cmpi ne, %1, %c0_i32_0 : i32
    scf.if %2 {
      %cst_10 = arith.constant 0.000000e+00 : f32
      %13 = vector.broadcast %cst_10 : f32 to vector<16x128xf32>
      %c0_11 = arith.constant 0 : index
      %c0_12 = arith.constant 0 : index
      %14 = vector.load %arg8[%c0_11, %c0_12] : memref<16x128xf32, #tpu.memory_space<vmem>>, vector<16x128xf32>
      tpu.vector_store %arg8[%c0_11, %c0_12], %13 {strides = array<i32>} : memref<16x128xf32, #tpu.memory_space<vmem>>, vector<16x128xf32>,
    } else {
    }
    %c0 = arith.constant 0 : index
    %c0_1 = arith.constant 0 : index
    %3 = vector.load %arg8[%c0, %c0_1] : memref<16x128xf32, #tpu.memory_space<vmem>>, vector<16x128xf32>
    %c0_2 = arith.constant 0 : index
    %c0_3 = arith.constant 0 : index
    %4 = vector.load %arg3[%c0_2, %c0_3] : memref<16x128xf32, #tpu.memory_space<vmem>>, vector<16x128xf32>
    %c0_4 = arith.constant 0 : index
    %c0_5 = arith.constant 0 : index
    %5 = vector.load %arg4[%c0_4, %c0_5] : memref<128x128xf32, #tpu.memory_space<vmem>>, vector<128x128xf32>
    %6 = tpu.transpose %5, [1, 0] : vector<128x128xf32> -> vector<128x128xf32>
    %cst = arith.constant dense<0.000000e+00> : vector<16x128xf32>
    %7 = tpu.matmul %4, %6, %cst {dimension_numbers = #tpu.dot_dimension_numbers<[1], [0], [0], [1], [0, 0, 1, 1], [], []>} : vector<16x128xf32>, vector<128x128xf32>, vector<16x128xf32> -> vector<16x128xf32>
    %8 = arith.addf %3, %7 : vector<16x128xf32>
    %c0_6 = arith.constant 0 : index
    %c0_7 = arith.constant 0 : index
    %9 = vector.load %arg8[%c0_6, %c0_7] : memref<16x128xf32, #tpu.memory_space<vmem>>, vector<16x128xf32>
    tpu.vector_store %arg8[%c0_6, %c0_7], %8 {strides = array<i32>} : memref<16x128xf32, #tpu.memory_space<vmem>>, vector<16x128xf32>,
    %c0_i32_8 = arith.constant 0 : i32
    %10 = arith.cmpi eq, %arg2, %c0_i32_8 : i32
    %11 = arith.extui %10 : i1 to i32
    %c0_i32_9 = arith.constant 0 : i32
    %12 = arith.cmpi ne, %11, %c0_i32_9 : i32
    scf.if %12 {
      %c0_10 = arith.constant 0 : index
      %c0_11 = arith.constant 0 : index
      %13 = vector.load %arg6[%c0_10, %c0_11] : memref<16x128xf32, #tpu.memory_space<vmem>>, vector<16x128xf32>
      %c0_12 = arith.constant 0 : index
      %c0_13 = arith.constant 0 : index
      %14 = vector.load %arg5[%c0_12, %c0_13] : memref<16x128xf32, #tpu.memory_space<vmem>>, vector<16x128xf32>
      %c0_14 = arith.constant 0 : index
      %c0_15 = arith.constant 0 : index
      %15 = vector.load %arg8[%c0_14, %c0_15] : memref<16x128xf32, #tpu.memory_space<vmem>>, vector<16x128xf32>
      %16 = arith.mulf %14, %15 : vector<16x128xf32>
      %17 = arith.addf %13, %16 : vector<16x128xf32>
      %c0_16 = arith.constant 0 : index
      %c0_17 = arith.constant 0 : index
      %18 = vector.load %arg7[%c0_16, %c0_17] : memref<16x128xf32, #tpu.memory_space<vmem>>, vector<16x128xf32>
      tpu.vector_store %arg7[%c0_16, %c0_17], %17 {strides = array<i32>} : memref<16x128xf32, #tpu.memory_space<vmem>>, vector<16x128xf32>,
    } else {
    }
    return
  }
  func.func @transform_0(%arg0: i32, %arg1: i32, %arg2: i32) -> (i32, i32) {
    %c0_i32 = arith.constant 0 : i32
    return %arg0, %arg2 : i32, i32
  }
  func.func @transform_1(%arg0: i32, %arg1: i32, %arg2: i32) -> (i32, i32) {
    %c0_i32 = arith.constant 0 : i32
    return %arg1, %arg2 : i32, i32
  }
  func.func @transform_2(%arg0: i32, %arg1: i32, %arg2: i32) -> (i32, i32) {
    %c0_i32 = arith.constant 0 : i32
    return %arg0, %arg1 : i32, i32
  }
  func.func @transform_3(%arg0: i32, %arg1: i32, %arg2: i32) -> (i32, i32) {
    %c0_i32 = arith.constant 0 : i32
    return %arg0, %arg1 : i32, i32
  }
  func.func @transform_4(%arg0: i32, %arg1: i32, %arg2: i32) -> (i32, i32) {
    %c0_i32 = arith.constant 0 : i32
    return %arg0, %arg1 : i32, i32
  }
}

</mosaic_0001>

<bundles_post_ra>
// kernel: tpu_custom_call.1
= control target key start
LH: loop header
LB: loop body
LE: loop exit
PB: predicated region body
PF: predicated region fallthrough
CT: control target
= control target key end

     0   :  { %9 = vsyncpa [#allocation4], 0  ;;  %s383_s0 = inlined_call_operand.hbm [shape: f32[16,128], index: 0, kind: input, shape index: {}]   ;;  %s384_s1 = inlined_call_operand.hbm [shape: f32[128,128], index: 1, kind: input, shape index: {}]   ;;  %s385_s2 = inlined_call_operand.hbm [shape: f32[16,128], index: 2, kind: input, shape index: {}]   ;;  %s386_s3 = inlined_call_operand.hbm [shape: f32[16,128], index: 3, kind: input, shape index: {}]   ;;  %s387_s4 = inlined_call_operand.hbm [shape: f32[16,128], index: 4, kind: output, shape index: {}]  }
   0x1   :  { %10 = vsyncpa [#allocation7], 0 }
   0x2   :  { %11 = vsyncpa [#allocation10], 0 }
   0x3   :  { %12 = vsyncpa [#allocation5], 0  ;;  %s30_s17 = sshll.u32 %s384_s1, 4  ;;  %s321_s18 = smov [#allocation6]   ;;  %s31_s17 = int_to_ptr.hbm [resolvable:$true] %s30_s17 }
   0x4   :  { %s32_s19 = sshll.u32 %s321_s18, 4  ;;  %s17_s22 = sshll.u32 %s383_s0, 4  ;;  %s33_s19 = int_to_ptr.vmem [resolvable:$true] %s32_s19  ;;  %s18_s22 = int_to_ptr.hbm [resolvable:$true] %s17_s22 }
   0x5   :  { %s322_s23 = smov 128   ;;  %s323_s24 = smov 8  }
   0x6   :  { %38 = dma.hbm_to_vmem [thread:$0]  %s31_s17, 2048, %s33_s19, [#allocation7], %s322_s23, %s322_s23, %s323_s24  }
   0x7   :  { %s324_s25 = smov [#allocation3]   ;;  %s43_s1 = sshll.u32 %s385_s2, 4  ;;  %s44_s1 = int_to_ptr.hbm [resolvable:$true] %s43_s1 }
   0x8   :  { %s19_s26 = sshll.u32 %s324_s25, 4  ;;  %s56_s30 = sshll.u32 %s386_s3, 4  ;;  %s20_s26 = int_to_ptr.vmem [resolvable:$true] %s19_s26  ;;  %s57_s30 = int_to_ptr.hbm [resolvable:$true] %s56_s30 }
   0x9   :  { %25 = dma.hbm_to_vmem [thread:$0]  %s18_s22, 256, %s20_s26, [#allocation4], %s322_s23, %s322_s23, %s323_s24  }
   0xa   :  { %s325_s5 = smov [#allocation8]   ;;  %s326_s7 = smov [#allocation9]  }
   0xb   :  { %s45_s6 = sshll.u32 %s325_s5, 4  ;;  %s58_s2 = sshll.u32 %s326_s7, 4  ;;  %s46_s6 = int_to_ptr.vmem [resolvable:$true] %s45_s6  ;;  %s59_s2 = int_to_ptr.vmem [resolvable:$true] %s58_s2 }
   0xc   :  { %51 = dma.hbm_to_vmem [thread:$0]  %s44_s1, 256, %s46_s6, [#allocation7], %s322_s23, %s322_s23, %s323_s24  }
   0xd   :  { %64 = dma.hbm_to_vmem [thread:$0]  %s57_s30, 256, %s59_s2, [#allocation10], %s322_s23, %s322_s23, %s323_s24  }
   0xe   :  { %313 = dma.done.wait [#allocation4], 256  }
   0xf   :  { %314 = vsyncadd [#allocation4], 4294967040 }
  0x10   :  { %315 = dma.done.wait [#allocation7], 2304  }
  0x11   :  { %316 = vsyncadd [#allocation7], 4294964992 }
  0x12   :  { %317 = dma.done.wait [#allocation10], 256  }
  0x13   :  { %318 = vsyncadd [#allocation10], 4294967040  ;;  %v106_v0 = vld [vmem:[#allocation6 + $0x78] sm:$0xff]  ;;  %v105_v1 = vld [vmem:[#allocation6 + $0x70] sm:$0xff]  ;;  %s327_s3 = smov [#allocation11]   ;;  %s155_s11 = sshll.u32 %s387_s4, 4  ;;  %s156_s11 = int_to_ptr.hbm [resolvable:$true] %s155_s11 }
  0x14   :  { %107 = vmatpush.xpose.msra.mxu0 %v106_v0  ;;  %170 = vmatpush.xpose.msra.mxu1 %v106_v0  ;;  %v104_v2 = vld [vmem:[#allocation6 + $0x68] sm:$0xff]  ;;  %v103_v3 = vld [vmem:[#allocation6 + $0x60] sm:$0xff]  ;;  %v102_v4 = vld [vmem:[#allocation6 + $0x58] sm:$0xff]  ;;  %s153_s8 = sshll.u32 %s327_s3, 4  ;;  %s154_s8 = int_to_ptr.vmem [resolvable:$true] %s153_s8 }
  0x15   :  { %v101_v5 = vld [vmem:[#allocation6 + $0x50] sm:$0xff]  ;;  %v100_v6 = vld [vmem:[#allocation6 + $0x48] sm:$0xff]  ;;  %v99_v7 = vld [vmem:[#allocation6 + $0x40] sm:$0xff] }
  0x16   :  { %v98_v8 = vld [vmem:[#allocation6 + $0x38] sm:$0xff]  ;;  %v97_v9 = vld [vmem:[#allocation6 + $0x30] sm:$0xff]  ;;  %v96_v10 = vld [vmem:[#allocation6 + $0x28] sm:$0xff] }
  0x17   :  { %v95_v11 = vld [vmem:[#allocation6 + $0x20] sm:$0xff]  ;;  %v94_v12 = vld [vmem:[#allocation6 + $0x18] sm:$0xff]  ;;  %v93_v13 = vld [vmem:[#allocation6 + $0x10] sm:$0xff] }
  0x18   :  { %108 = vmatpush.xpose.msra.mxu0 %v105_v1  ;;  %171 = vmatpush.xpose.msra.mxu1 %v105_v1  ;;  %v92_v14 = vld [vmem:[#allocation6 + $0x8] sm:$0xff]  ;;  %v91_v15 = vld [vmem:[#allocation6] sm:$0xff]  ;;  %v89_v16 = vld [vmem:[#allocation3] sm:$0xff] }
  0x19   :  { %v90_v17 = vld [vmem:[#allocation3 + $0x8] sm:$0xff]  ;;  %v139_v18 = vld [vmem:[#allocation8] sm:$0xff]  ;;  %v140_v19 = vld [vmem:[#allocation8 + $0x8] sm:$0xff] }
  0x1a   :  { %v137_v21 = vld [vmem:[#allocation9] sm:$0xff]  ;;  %v138_v23 = vld [vmem:[#allocation9 + $0x8] sm:$0xff] }
  0x1c   :  { %109 = vmatpush.xpose.msra.mxu0 %v104_v2  ;;  %172 = vmatpush.xpose.msra.mxu1 %v104_v2 }
  0x20   :  { %110 = vmatpush.xpose.msra.mxu0 %v103_v3  ;;  %173 = vmatpush.xpose.msra.mxu1 %v103_v3 }
  0x24   :  { %111 = vmatpush.xpose.msra.mxu0 %v102_v4  ;;  %174 = vmatpush.xpose.msra.mxu1 %v102_v4 }
  0x28   :  { %112 = vmatpush.xpose.msra.mxu0 %v101_v5  ;;  %175 = vmatpush.xpose.msra.mxu1 %v101_v5 }
  0x2c   :  { %113 = vmatpush.xpose.msra.mxu0 %v100_v6  ;;  %176 = vmatpush.xpose.msra.mxu1 %v100_v6 }
  0x30   :  { %114 = vmatpush.xpose.msra.mxu0 %v99_v7  ;;  %177 = vmatpush.xpose.msra.mxu1 %v99_v7 }
  0x34   :  { %115 = vmatpush.xpose.msra.mxu0 %v98_v8  ;;  %178 = vmatpush.xpose.msra.mxu1 %v98_v8 }
  0x38   :  { %116 = vmatpush.xpose.msra.mxu0 %v97_v9  ;;  %179 = vmatpush.xpose.msra.mxu1 %v97_v9 }
  0x3c   :  { %117 = vmatpush.xpose.msra.mxu0 %v96_v10  ;;  %180 = vmatpush.xpose.msra.mxu1 %v96_v10 }
  0x40   :  { %118 = vmatpush.xpose.msra.mxu0 %v95_v11  ;;  %181 = vmatpush.xpose.msra.mxu1 %v95_v11 }
  0x44   :  { %119 = vmatpush.xpose.msra.mxu0 %v94_v12  ;;  %182 = vmatpush.xpose.msra.mxu1 %v94_v12 }
  0x48   :  { %120 = vmatpush.xpose.msra.mxu0 %v93_v13  ;;  %183 = vmatpush.xpose.msra.mxu1 %v93_v13 }
  0x4c   :  { %121 = vmatpush.xpose.msra.mxu0 %v92_v14  ;;  %184 = vmatpush.xpose.msra.mxu1 %v92_v14 }
  0x50   :  { %122 = vmatpush.xpose.msra.mxu0 %v91_v15  ;;  %185 = vmatpush.xpose.msra.mxu1 %v91_v15 }
  0x53   :  { %123 = vmatmul.f32.vlgmr.msra.gmra.mxu0 %v89_v16  ;;  %126 = vmatmul.f32.vlgmr.msra.gmra.mxu1 %v90_v17 }
  0xd0   :  { %v124_v20 = vpop.f32.mrf.mxu0  ;;  %v127_v22 = vpop.f32.mrf.mxu1 }
  0xd1   :  { %v143_v24 = vmul.f32 %v139_v18, %v124_v20  ;;  %v144_v25 = vmul.f32 %v140_v19, %v127_v22 }
  0xd3   :  { %v145_v26 = vadd.f32 %v143_v24, %v137_v21  ;;  %v146_v27 = vadd.f32 %v144_v25, %v138_v23 }
  0xd5   :  { %147 = vst [vmem:[#allocation11] sm:$0xff] %v145_v26 }
  0xd6   :  { %148 = vst [vmem:[#allocation11 + $0x8] sm:$0xff] %v146_v27 }
  0xd7   :  { %161 = dma.vmem_to_hbm [thread:$0]  %s154_s8, 256, %s156_s11, [#allocation5], %s322_s23, %s322_s23, %s323_s24  }
  0xd8   :  { %319 = dma.done.wait [#allocation5], 256  }
  0xd9   :  { %320 = vsyncadd [#allocation5], 4294967040 }
  0xda   :  { %166 = vsyncpa [#allocation4], 1 }
  0xdb   :  { %167 = vsyncpa [#allocation7], 1 }
  0xdc   :  { %168 = vsyncpa [#allocation10], 1 }
  0xdd   :  { %169 = vsyncpa [#allocation5], 1 }

</bundles_post_ra>
